<compile_context>
chip_gen: v6e
topology: v6e:2x2x1
jax: 0.10.0
libtpu: 0.0.40
codegen_flags: <defaults>
</compile_context>

<pallas_src>
import jax
import jax.numpy as jnp
from jax.experimental import pallas as pl
from jax.experimental.pallas import tpu as pltpu

BN_EPS = 1e-5
_TARGET_BLOCK_BYTES = 2 << 20  # ~2 MiB of block data per grid step (1-4 MiB range)


def _vmem_capacity_bytes():
    try:
        return int(pltpu.get_tpu_info().vmem_capacity_bytes)
    except Exception:
        return 64 << 20  # conservative fallback (v7x per-core VMEM)


def _pick_spatial_tile(hw_pad, c_in, c_out, vmem_limit_bytes):
    """Largest TM (multiple of 128, dividing hw_pad) such that
    (c_in + c_out) * TM * 4B ~= _TARGET_BLOCK_BYTES, and the double-buffered
    input+output blocks stay within half of the scoped-VMEM budget."""
    per_lane_bytes = (c_in + c_out) * 4
    tm_target = max(128, (_TARGET_BLOCK_BYTES // per_lane_bytes) // 128 * 128)
    tm_vmem = max(128, ((vmem_limit_bytes // 2) // (2 * per_lane_bytes)) // 128 * 128)
    tm = min(hw_pad, tm_target, tm_vmem)
    tm = max(128, (tm // 128) * 128)
    while tm > 128 and hw_pad % tm != 0:
        tm -= 128
    return tm


# ----------------------------- kernels ---------------------------------------

def _stats_kernel(x_ref, w_ref, sum_ref, sumsq_ref):
    """Pass 1 (C_in <= 2*C_out): per-batch partial sum / sum-sq of y = W @ x."""
    @pl.when(pl.program_id(1) == 0)
    def _():
        sum_ref[...] = jnp.zeros_like(sum_ref)
        sumsq_ref[...] = jnp.zeros_like(sumsq_ref)

    y = jnp.dot(w_ref[...], x_ref[...], preferred_element_type=jnp.float32)
    sum_ref[...] += jnp.sum(y, axis=1, keepdims=True)
    sumsq_ref[...] += jnp.sum(y * y, axis=1, keepdims=True)


def _conv_stats_kernel(x_ref, w_ref, y_ref, sum_ref, sumsq_ref):
    """Pass 1 (C_in > 2*C_out): store y = W @ x and accumulate per-batch stats."""
    @pl.when(pl.program_id(1) == 0)
    def _():
        sum_ref[...] = jnp.zeros_like(sum_ref)
        sumsq_ref[...] = jnp.zeros_like(sumsq_ref)

    y = jnp.dot(w_ref[...], x_ref[...], preferred_element_type=jnp.float32)
    y_ref[...] = y
    sum_ref[...] += jnp.sum(y, axis=1, keepdims=True)
    sumsq_ref[...] += jnp.sum(y * y, axis=1, keepdims=True)


def _conv_apply_kernel(x_ref, w_ref, s_ref, t_ref, o_ref):
    """Pass 2 (C_in <= 2*C_out): out = relu((W @ x) * s + t)."""
    y = jnp.dot(w_ref[...], x_ref[...], preferred_element_type=jnp.float32)
    o_ref[...] = jnp.maximum(y * s_ref[...] + t_ref[...], 0.0).astype(o_ref.dtype)


def _bn_relu_kernel(y_ref, s_ref, t_ref, o_ref):
    """Pass 2 (C_in > 2*C_out): pure elementwise out = relu(y * s + t)."""
    o_ref[...] = jnp.maximum(y_ref[...] * s_ref[...] + t_ref[...], 0.0).astype(o_ref.dtype)


# ----------------------------- wrapper ----------------------------------------

def attention_module_forward(x_nchw, conv_w, conv_b, bn_gamma, bn_beta):
    """Forward pass matching AttentionModule (1x1 conv -> train-mode BN -> ReLU).

    x_nchw : (N, C_in, H, W) f32
    conv_w : (C_out, C_in, 1, 1), conv_b: (C_out,), bn_gamma/bn_beta: (C_out,)
    returns: (N, C_out, H, W) f32
    """
    N, C_in, H, W = x_nchw.shape
    C_out = conv_w.shape[0]
    HW = H * W
    HW_pad = ((HW + 127) // 128) * 128  # keep lane dim a multiple of 128

    vmem_cap = _vmem_capacity_bytes()
    vmem_limit = int(max(32 << 20, (min(vmem_cap, 128 << 20) * 3) // 4))
    vmem_limit = int(min(vmem_limit, vmem_cap))
    TM = _pick_spatial_tile(HW_pad, C_in, C_out, vmem_limit)
    MT = HW_pad // TM

    # Pure reshape (+ zero pad) only -- no HBM transposes in the wrapper.
    x3 = x_nchw.reshape(N, C_in, HW).astype(jnp.float32)
    if HW_pad != HW:
        # Zero columns contribute 0 to sum/sum-sq (divisor uses true N*HW) and
        # are sliced off before the final reshape.
        x3 = jnp.pad(x3, ((0, 0), (0, 0), (0, HW_pad - HW)))
    w_mat = conv_w.reshape(C_out, C_in).astype(jnp.float32)  # PyTorch layout as-is

    stats_params = pltpu.CompilerParams(
        dimension_semantics=("parallel", "arbitrary"),
        vmem_limit_bytes=vmem_limit)
    apply_params = pltpu.CompilerParams(
        dimension_semantics=("parallel", "parallel"),
        vmem_limit_bytes=vmem_limit)

    fused = C_in > 2 * C_out  # avoid the second full read of x when x dominates traffic

    # ---- Pass 1: per-channel batch statistics (per-batch partials) -----------
    if fused:
        y3, psum, psumsq = pl.pallas_call(
            _conv_stats_kernel,
            out_shape=(jax.ShapeDtypeStruct((N, C_out, HW_pad), jnp.float32),
                       jax.ShapeDtypeStruct((N, C_out, 1), jnp.float32),
                       jax.ShapeDtypeStruct((N, C_out, 1), jnp.float32)),
            grid_spec=pltpu.PrefetchScalarGridSpec(
                num_scalar_prefetch=0,
                grid=(N, MT),
                in_specs=[
                    pl.BlockSpec((None, C_in, TM), lambda n, m: (n, 0, m)),
                    pl.BlockSpec((C_out, C_in), lambda n, m: (0, 0)),
                ],
                out_specs=[
                    pl.BlockSpec((None, C_out, TM), lambda n, m: (n, 0, m)),
                    pl.BlockSpec((None, C_out, 1), lambda n, m: (n, 0, 0)),
                    pl.BlockSpec((None, C_out, 1), lambda n, m: (n, 0, 0)),
                ],
            ),
            compiler_params=stats_params,
        )(x3, w_mat)
    else:
        psum, psumsq = pl.pallas_call(
            _stats_kernel,
            out_shape=(jax.ShapeDtypeStruct((N, C_out, 1), jnp.float32),
                       jax.ShapeDtypeStruct((N, C_out, 1), jnp.float32)),
            grid_spec=pltpu.PrefetchScalarGridSpec(
                num_scalar_prefetch=0,
                grid=(N, MT),
                in_specs=[
                    pl.BlockSpec((None, C_in, TM), lambda n, m: (n, 0, m)),
                    pl.BlockSpec((C_out, C_in), lambda n, m: (0, 0)),
                ],
                out_specs=[
                    pl.BlockSpec((None, C_out, 1), lambda n, m: (n, 0, 0)),
                    pl.BlockSpec((None, C_out, 1), lambda n, m: (n, 0, 0)),
                ],
            ),
            compiler_params=stats_params,
        )(x3, w_mat)

    # ---- Fold conv bias + train-mode BN into per-channel scale/shift ----------
    # mean(W@x + b) = mean_nb + b; variance is bias-invariant.
    m_total = jnp.float32(N * HW)
    sum_tot = jnp.sum(psum, axis=0)       # (C_out, 1)
    sumsq_tot = jnp.sum(psumsq, axis=0)   # (C_out, 1)
    mean_nb = sum_tot / m_total
    # Single-pass variance (E[y^2] - E[y]^2) in f32; clamp guards tiny negatives.
    # TODO(synk): use a centered / Welford-style accumulation if |mean| >> std on real data.
    var = jnp.maximum(sumsq_tot / m_total - mean_nb * mean_nb, 0.0)
    gamma = bn_gamma.reshape(C_out, 1).astype(jnp.float32)
    beta = bn_beta.reshape(C_out, 1).astype(jnp.float32)
    scale = gamma * jax.lax.rsqrt(var + BN_EPS)     # (C_out, 1)
    shift = beta - mean_nb * scale                  # applied to bias-free y
    del conv_b  # bias cancels exactly inside train-mode BN (folded into shift)

    # ---- Pass 2: apply scale/shift + ReLU -------------------------------------
    if fused:
        out3 = pl.pallas_call(
            _bn_relu_kernel,
            out_shape=jax.ShapeDtypeStruct((N, C_out, HW_pad), jnp.float32),
            grid_spec=pltpu.PrefetchScalarGridSpec(
                num_scalar_prefetch=0,
                grid=(N, MT),
                in_specs=[
                    pl.BlockSpec((None, C_out, TM), lambda n, m: (n, 0, m)),
                    pl.BlockSpec((C_out, 1), lambda n, m: (0, 0)),
                    pl.BlockSpec((C_out, 1), lambda n, m: (0, 0)),
                ],
                out_specs=pl.BlockSpec((None, C_out, TM), lambda n, m: (n, 0, m)),
            ),
            compiler_params=apply_params,
            input_output_aliases={0: 0},  # BN+ReLU in place over the conv output
        )(y3, scale, shift)
    else:
        out3 = pl.pallas_call(
            _conv_apply_kernel,
            out_shape=jax.ShapeDtypeStruct((N, C_out, HW_pad), jnp.float32),
            grid_spec=pltpu.PrefetchScalarGridSpec(
                num_scalar_prefetch=0,
                grid=(N, MT),
                in_specs=[
                    pl.BlockSpec((None, C_in, TM), lambda n, m: (n, 0, m)),
                    pl.BlockSpec((C_out, C_in), lambda n, m: (0, 0)),
                    pl.BlockSpec((C_out, 1), lambda n, m: (0, 0)),
                    pl.BlockSpec((C_out, 1), lambda n, m: (0, 0)),
                ],
                out_specs=pl.BlockSpec((None, C_out, TM), lambda n, m: (n, 0, m)),
            ),
            compiler_params=apply_params,
        )(x3, w_mat, scale, shift)

    out3 = out3[:, :, :HW]
    return out3.reshape(N, C_out, H, W)


# ----------------------------- reference & test --------------------------------

def _reference(x, conv_w, conv_b, bn_gamma, bn_beta):
    """Pure-JAX reference (PyTorch train-mode BN forward)."""
    N, C_in, H, W = x.shape
    C_out = conv_w.shape[0]
    w = conv_w.reshape(C_out, C_in)
    y = jnp.einsum("oc,nchw->nohw", w, x, precision=jax.lax.Precision.HIGHEST)
    y = y + conv_b.reshape(1, C_out, 1, 1)
    mean = jnp.mean(y, axis=(0, 2, 3), keepdims=True)
    var = jnp.mean((y - mean) ** 2, axis=(0, 2, 3), keepdims=True)
    y_hat = (y - mean) * jax.lax.rsqrt(var + BN_EPS)
    out = y_hat * bn_gamma.reshape(1, C_out, 1, 1) + bn_beta.reshape(1, C_out, 1, 1)
    return jnp.maximum(out, 0.0)


if __name__ == "__main__":
    forward = jax.jit(attention_module_forward)

    def _check(key, N, C_in, C_out, H, W, tol):
        k_x, k_w, k_b = jax.random.split(key, 3)
        x = jax.random.normal(k_x, (N, C_in, H, W), dtype=jnp.float32)
        conv_w = jax.random.normal(k_w, (C_out, C_in, 1, 1), dtype=jnp.float32) * 0.1
        conv_b = jax.random.normal(k_b, (C_out,), dtype=jnp.float32) * 0.1
        bn_gamma = jnp.ones((C_out,), dtype=jnp.float32)   # PyTorch default weight
        bn_beta = jnp.zeros((C_out,), dtype=jnp.float32)   # PyTorch default bias

        out = forward(x, conv_w, conv_b, bn_gamma, bn_beta)
        jax.block_until_ready(out)

        ref = _reference(x, conv_w, conv_b, bn_gamma, bn_beta)
        assert out.shape == (N, C_out, H, W)
        assert bool(jnp.all(out >= 0.0))  # ReLU post-condition
        err = float(jnp.max(jnp.abs(out - ref)))
        assert err < tol, (
            f"max abs error {err} (N={N}, C_in={C_in}, C_out={C_out}, H={H}, W={W})")

    key = jax.random.PRNGKey(0)
    k1, k2, k3 = jax.random.split(key, 3)
    # Spec-shaped case (C_in <= 2*C_out): two matmul passes.
    _check(k1, N=2, C_in=4, C_out=4, H=16, W=16, tol=2e-3)
    # Many input channels (C_in > 2*C_out): fused conv+stats pass, elementwise BN+ReLU pass.
    _check(k2, N=2, C_in=32, C_out=4, H=32, W=32, tol=5e-3)
    # Awkward spatial extent (H*W % 128 != 0): zero-padded lane-dense tiles.
    _check(k3, N=2, C_in=24, C_out=4, H=10, W=10, tol=5e-3)

    print("KERNEL_OK")
</pallas_src>

<mosaic_0001>
module attributes {stable_mosaic.version = 11 : i64} {
  func.func @_stats_kernel(%arg0: i32, %arg1: i32, %arg2: memref<1x4x256xf32, #tpu.memory_space<vmem>>, %arg3: memref<4x4xf32, #tpu.memory_space<vmem>>, %arg4: memref<1x4x1xf32, #tpu.memory_space<vmem>>, %arg5: memref<1x4x1xf32, #tpu.memory_space<vmem>>) attributes {dimension_semantics = [#tpu.dimension_semantics<parallel>, #tpu.dimension_semantics<arbitrary>], iteration_bounds = array<i64: 2, 1>, scalar_prefetch = 0 : i64, scratch_operands = 0 : i64, tpu.core_type = #tpu.core_type<tc>, window_params = [{transform_indices = @transform_0, window_bounds = array<i64: 1, 4, 256>}, {pipeline_mode = #tpu.pipeline_mode<synchronous>, transform_indices = @transform_1, window_bounds = array<i64: 4, 4>}, {transform_indices = @transform_2, window_bounds = array<i64: 1, 4, 1>}, {transform_indices = @transform_3, window_bounds = array<i64: 1, 4, 1>}]} {
    %c0_i32 = arith.constant 0 : i32
    %0 = arith.cmpi eq, %arg1, %c0_i32 : i32
    %1 = arith.extui %0 : i1 to i32
    %c0_i32_0 = arith.constant 0 : i32
    %2 = arith.cmpi ne, %1, %c0_i32_0 : i32
    scf.if %2 {
      %cst_19 = arith.constant 0.000000e+00 : f32
      %24 = vector.broadcast %cst_19 : f32 to vector<4x1xf32>
      %c0_20 = arith.constant 0 : index
      %c0_21 = arith.constant 0 : index
      %c0_22 = arith.constant 0 : index
      %25 = vector.load %arg4[%c0_20, %c0_21, %c0_22] : memref<1x4x1xf32, #tpu.memory_space<vmem>>, vector<1x4x1xf32>
      %26 = vector.shape_cast %25 : vector<1x4x1xf32> to vector<4x1xf32>
      %27 = vector.shape_cast %24 : vector<4x1xf32> to vector<1x4x1xf32>
      tpu.vector_store %arg4[%c0_20, %c0_21, %c0_22], %27 {strides = array<i32>} : memref<1x4x1xf32, #tpu.memory_space<vmem>>, vector<1x4x1xf32>,
      %cst_23 = arith.constant 0.000000e+00 : f32
      %28 = vector.broadcast %cst_23 : f32 to vector<4x1xf32>
      %c0_24 = arith.constant 0 : index
      %c0_25 = arith.constant 0 : index
      %c0_26 = arith.constant 0 : index
      %29 = vector.load %arg5[%c0_24, %c0_25, %c0_26] : memref<1x4x1xf32, #tpu.memory_space<vmem>>, vector<1x4x1xf32>
      %30 = vector.shape_cast %29 : vector<1x4x1xf32> to vector<4x1xf32>
      %31 = vector.shape_cast %28 : vector<4x1xf32> to vector<1x4x1xf32>
      tpu.vector_store %arg5[%c0_24, %c0_25, %c0_26], %31 {strides = array<i32>} : memref<1x4x1xf32, #tpu.memory_space<vmem>>, vector<1x4x1xf32>,
    } else {
    }
    %c0 = arith.constant 0 : index
    %c0_1 = arith.constant 0 : index
    %3 = vector.load %arg3[%c0, %c0_1] : memref<4x4xf32, #tpu.memory_space<vmem>>, vector<4x4xf32>
    %c0_2 = arith.constant 0 : index
    %c0_3 = arith.constant 0 : index
    %c0_4 = arith.constant 0 : index
    %4 = vector.load %arg2[%c0_2, %c0_3, %c0_4] : memref<1x4x256xf32, #tpu.memory_space<vmem>>, vector<1x4x256xf32>
    %5 = vector.shape_cast %4 : vector<1x4x256xf32> to vector<4x256xf32>
    %cst = arith.constant dense<0.000000e+00> : vector<4x256xf32>
    %6 = tpu.matmul %3, %5, %cst {dimension_numbers = #tpu.dot_dimension_numbers<[1], [0], [0], [1], [0, 0, 1, 1], [], []>} : vector<4x4xf32>, vector<4x256xf32>, vector<4x256xf32> -> vector<4x256xf32>
    %c0_5 = arith.constant 0 : index
    %c0_6 = arith.constant 0 : index
    %c0_7 = arith.constant 0 : index
    %7 = vector.load %arg4[%c0_5, %c0_6, %c0_7] : memref<1x4x1xf32, #tpu.memory_space<vmem>>, vector<1x4x1xf32>
    %8 = vector.shape_cast %7 : vector<1x4x1xf32> to vector<4x1xf32>
    %cst_8 = arith.constant dense<0.000000e+00> : vector<4xf32>
    %9 = vector.multi_reduction <add>, %6, %cst_8 [1] : vector<4x256xf32> to vector<4xf32>
    %10 = vector.shape_cast %9 : vector<4xf32> to vector<4x1xf32>
    %11 = arith.addf %8, %10 : vector<4x1xf32>
    %c0_9 = arith.constant 0 : index
    %c0_10 = arith.constant 0 : index
    %c0_11 = arith.constant 0 : index
    %12 = vector.load %arg4[%c0_9, %c0_10, %c0_11] : memref<1x4x1xf32, #tpu.memory_space<vmem>>, vector<1x4x1xf32>
    %13 = vector.shape_cast %12 : vector<1x4x1xf32> to vector<4x1xf32>
    %14 = vector.shape_cast %11 : vector<4x1xf32> to vector<1x4x1xf32>
    tpu.vector_store %arg4[%c0_9, %c0_10, %c0_11], %14 {strides = array<i32>} : memref<1x4x1xf32, #tpu.memory_space<vmem>>, vector<1x4x1xf32>,
    %c0_12 = arith.constant 0 : index
    %c0_13 = arith.constant 0 : index
    %c0_14 = arith.constant 0 : index
    %15 = vector.load %arg5[%c0_12, %c0_13, %c0_14] : memref<1x4x1xf32, #tpu.memory_space<vmem>>, vector<1x4x1xf32>
    %16 = vector.shape_cast %15 : vector<1x4x1xf32> to vector<4x1xf32>
    %17 = arith.mulf %6, %6 : vector<4x256xf32>
    %cst_15 = arith.constant dense<0.000000e+00> : vector<4xf32>
    %18 = vector.multi_reduction <add>, %17, %cst_15 [1] : vector<4x256xf32> to vector<4xf32>
    %19 = vector.shape_cast %18 : vector<4xf32> to vector<4x1xf32>
    %20 = arith.addf %16, %19 : vector<4x1xf32>
    %c0_16 = arith.constant 0 : index
    %c0_17 = arith.constant 0 : index
    %c0_18 = arith.constant 0 : index
    %21 = vector.load %arg5[%c0_16, %c0_17, %c0_18] : memref<1x4x1xf32, #tpu.memory_space<vmem>>, vector<1x4x1xf32>
    %22 = vector.shape_cast %21 : vector<1x4x1xf32> to vector<4x1xf32>
    %23 = vector.shape_cast %20 : vector<4x1xf32> to vector<1x4x1xf32>
    tpu.vector_store %arg5[%c0_16, %c0_17, %c0_18], %23 {strides = array<i32>} : memref<1x4x1xf32, #tpu.memory_space<vmem>>, vector<1x4x1xf32>,
    return
  }
  func.func @transform_0(%arg0: i32, %arg1: i32) -> (i32, i32, i32) {
    %c0_i32 = arith.constant 0 : i32
    %c0_i32_0 = arith.constant 0 : i32
    return %arg0, %c0_i32, %arg1 : i32, i32, i32
  }
  func.func @transform_1(%arg0: i32, %arg1: i32) -> (i32, i32) {
    %c0_i32 = arith.constant 0 : i32
    %c0_i32_0 = arith.constant 0 : i32
    %c0_i32_1 = arith.constant 0 : i32
    return %c0_i32, %c0_i32_0 : i32, i32
  }
  func.func @transform_2(%arg0: i32, %arg1: i32) -> (i32, i32, i32) {
    %c0_i32 = arith.constant 0 : i32
    %c0_i32_0 = arith.constant 0 : i32
    %c0_i32_1 = arith.constant 0 : i32
    return %arg0, %c0_i32, %c0_i32_0 : i32, i32, i32
  }
  func.func @transform_3(%arg0: i32, %arg1: i32) -> (i32, i32, i32) {
    %c0_i32 = arith.constant 0 : i32
    %c0_i32_0 = arith.constant 0 : i32
    %c0_i32_1 = arith.constant 0 : i32
    return %arg0, %c0_i32, %c0_i32_0 : i32, i32, i32
  }
}

module attributes {stable_mosaic.version = 11 : i64} {
  func.func @_conv_apply_kernel(%arg0: i32, %arg1: i32, %arg2: memref<1x4x256xf32, #tpu.memory_space<vmem>>, %arg3: memref<4x4xf32, #tpu.memory_space<vmem>>, %arg4: memref<4x1xf32, #tpu.memory_space<vmem>>, %arg5: memref<4x1xf32, #tpu.memory_space<vmem>>, %arg6: memref<1x4x256xf32, #tpu.memory_space<vmem>>) attributes {dimension_semantics = [#tpu.dimension_semantics<parallel>, #tpu.dimension_semantics<parallel>], iteration_bounds = array<i64: 2, 1>, scalar_prefetch = 0 : i64, scratch_operands = 0 : i64, tpu.core_type = #tpu.core_type<tc>, window_params = [{transform_indices = @transform_0, window_bounds = array<i64: 1, 4, 256>}, {pipeline_mode = #tpu.pipeline_mode<synchronous>, transform_indices = @transform_1, window_bounds = array<i64: 4, 4>}, {pipeline_mode = #tpu.pipeline_mode<synchronous>, transform_indices = @transform_2, window_bounds = array<i64: 4, 1>}, {pipeline_mode = #tpu.pipeline_mode<synchronous>, transform_indices = @transform_3, window_bounds = array<i64: 4, 1>}, {transform_indices = @transform_4, window_bounds = array<i64: 1, 4, 256>}]} {
    %c0 = arith.constant 0 : index
    %c0_0 = arith.constant 0 : index
    %0 = vector.load %arg3[%c0, %c0_0] : memref<4x4xf32, #tpu.memory_space<vmem>>, vector<4x4xf32>
    %c0_1 = arith.constant 0 : index
    %c0_2 = arith.constant 0 : index
    %c0_3 = arith.constant 0 : index
    %1 = vector.load %arg2[%c0_1, %c0_2, %c0_3] : memref<1x4x256xf32, #tpu.memory_space<vmem>>, vector<1x4x256xf32>
    %2 = vector.shape_cast %1 : vector<1x4x256xf32> to vector<4x256xf32>
    %cst = arith.constant dense<0.000000e+00> : vector<4x256xf32>
    %3 = tpu.matmul %0, %2, %cst {dimension_numbers = #tpu.dot_dimension_numbers<[1], [0], [0], [1], [0, 0, 1, 1], [], []>} : vector<4x4xf32>, vector<4x256xf32>, vector<4x256xf32> -> vector<4x256xf32>
    %c0_4 = arith.constant 0 : index
    %c0_5 = arith.constant 0 : index
    %4 = vector.load %arg4[%c0_4, %c0_5] : memref<4x1xf32, #tpu.memory_space<vmem>>, vector<4x1xf32>
    %5 = vector.broadcast %4 : vector<4x1xf32> to vector<4x256xf32>
    %6 = arith.mulf %3, %5 : vector<4x256xf32>
    %c0_6 = arith.constant 0 : index
    %c0_7 = arith.constant 0 : index
    %7 = vector.load %arg5[%c0_6, %c0_7] : memref<4x1xf32, #tpu.memory_space<vmem>>, vector<4x1xf32>
    %8 = vector.broadcast %7 : vector<4x1xf32> to vector<4x256xf32>
    %9 = arith.addf %6, %8 : vector<4x256xf32>
    %cst_8 = arith.constant 0.000000e+00 : f32
    %10 = vector.broadcast %cst_8 : f32 to vector<4x256xf32>
    %11 = arith.maximumf %9, %10 : vector<4x256xf32>
    %c0_9 = arith.constant 0 : index
    %c0_10 = arith.constant 0 : index
    %c0_11 = arith.constant 0 : index
    %12 = vector.load %arg6[%c0_9, %c0_10, %c0_11] : memref<1x4x256xf32, #tpu.memory_space<vmem>>, vector<1x4x256xf32>
    %13 = vector.shape_cast %12 : vector<1x4x256xf32> to vector<4x256xf32>
    %14 = vector.shape_cast %11 : vector<4x256xf32> to vector<1x4x256xf32>
    tpu.vector_store %arg6[%c0_9, %c0_10, %c0_11], %14 {strides = array<i32>} : memref<1x4x256xf32, #tpu.memory_space<vmem>>, vector<1x4x256xf32>,
    return
  }
  func.func @transform_0(%arg0: i32, %arg1: i32) -> (i32, i32, i32) {
    %c0_i32 = arith.constant 0 : i32
    %c0_i32_0 = arith.constant 0 : i32
    return %arg0, %c0_i32, %arg1 : i32, i32, i32
  }
  func.func @transform_1(%arg0: i32, %arg1: i32) -> (i32, i32) {
    %c0_i32 = arith.constant 0 : i32
    %c0_i32_0 = arith.constant 0 : i32
    %c0_i32_1 = arith.constant 0 : i32
    return %c0_i32, %c0_i32_0 : i32, i32
  }
  func.func @transform_2(%arg0: i32, %arg1: i32) -> (i32, i32) {
    %c0_i32 = arith.constant 0 : i32
    %c0_i32_0 = arith.constant 0 : i32
    %c0_i32_1 = arith.constant 0 : i32
    return %c0_i32, %c0_i32_0 : i32, i32
  }
  func.func @transform_3(%arg0: i32, %arg1: i32) -> (i32, i32) {
    %c0_i32 = arith.constant 0 : i32
    %c0_i32_0 = arith.constant 0 : i32
    %c0_i32_1 = arith.constant 0 : i32
    return %c0_i32, %c0_i32_0 : i32, i32
  }
  func.func @transform_4(%arg0: i32, %arg1: i32) -> (i32, i32, i32) {
    %c0_i32 = arith.constant 0 : i32
    %c0_i32_0 = arith.constant 0 : i32
    return %arg0, %c0_i32, %arg1 : i32, i32, i32
  }
}

</mosaic_0001>

<bundles_post_ra>
// kernel: attention_module_forward.3
= control target key start
LH: loop header
LB: loop body
LE: loop exit
PB: predicated region body
PF: predicated region fallthrough
CT: control target
= control target key end

     0   :  { %s526_s15 = smov 0   ;;  %s528_s16 = smov 0   ;;  %s568_s0 = inlined_call_operand.vmem [shape: f32[2,4,256], index: 0, kind: input, shape index: {}]   ;;  %s569_s1 = inlined_call_operand.vmem [shape: f32[4,4], index: 1, kind: input, shape index: {}]   ;;  %s570_s2 = inlined_call_operand.vmem [shape: f32[4,1], index: 2, kind: input, shape index: {}]   ;;  %s571_s3 = inlined_call_operand.vmem [shape: f32[4,1], index: 3, kind: input, shape index: {}]   ;;  %s572_s4 = inlined_call_operand.vmem [shape: f32[2,4,256], index: 4, kind: output, shape index: {}]  }
   0x1   :  { %s530_s17 = smov 0  }
   0x2 LB: > { %s26_s18 = sadd.s32 1, %s493_s16  ;;  %p435_p0 = scmp.ge.s32.totalorder %s497_s17, 1  ;;  %s497_s17 = sphi %s530_s17, %s14_s17   ;;  %s493_s16 = sphi %s528_s16, %s574_s16   ;;  %s489_s15 = sphi %s526_s15, %s573_s15  }
   0x3   : > { %p28_p1 = scmp.ge.s32.totalorder %s26_s18, 2  ;;  %p183_p2 = scmp.lt.s32.totalorder %s497_s17, 3 }
   0x5   : > { %s576_s18 = smov (%p28_p1, %s26_s18), 0  ;;  %p184_p3 = pnand %p435_p0, %p183_p2 }
   0x6   : > { %p218_p4 = scmp.lt.s32.totalorder (!%p184_p3), %s489_s15, 1 }
   0x7   : > { %187 = sbr.rel (%p184_p3) target bundleno = 224 (0xe0), region = 36 }
   0xc   : > { %v499_v0 = vmov 0.0   ;;  %v321_v1 = vld [vmem:[%s570_s2] sm:$0xf]  ;;  %s578_s15 = smov (!%p218_p4, %s489_s15), 1  ;;  %v500_v2 = vmov 0   ;;  %vm245_vm0 = vcmask 1043456  }
   0xd   : > { %314 = vmatprep.mubr.f32.mxu0 %v499_v0  ;;  %473 = vset.pattern.permute.xlu0 %v500_v2  ;;  %s445_s21 = sshll.u32 %s578_s15, 3  ;;  %v329_v3 = vld [vmem:[%s571_s3] sm:$0xf]  ;;  %vm241_vm1 = vcmask 31744  }
   0xe   : > { %324 = vperm.xlu0 %473, %v321_v1   ;;  %s225_s26 = scalar_lea.vmem %s568_s0, %s445_s21  ;;  %v237_v6 = vld [vmem:[%s569_s1] sm:$0xf]  ;;  %s235_s5 = scalar_lea.vmem %s572_s4, %s445_s21 }
   0xf   : > { %v238_v4 = vld [vmem:[%s225_s26] sm:$0xff] }
  0x10   : > { %v240_v5 = vcombine.high %v238_v4, %v238_v4 }
  0x12   : > { %332 = vperm.xlu0 %473, %v329_v3   ;;  %440 = vmatprep.subr.msk.mxu0 %vm245_vm0, %v240_v5 }
  0x13   : > { %441 = vmatpush1.msk.msra.mxu0 %vm245_vm0, %v238_v4 }
  0x14   : > { %442 = vmatmul.mubr.msk.f32.vlgmr.msra.gmra.mxu0 %vm241_vm1, %v237_v6 }
  0x89   : > { %v325_v7 = vpop.permute.xlu0 %324 }
  0x8d   : > { %v333_v10 = vpop.permute.xlu0 %332 }
  0xd4   : > { %v316_v8 = vpop.f32.mrf.mxu0 }
  0xd5   : > { %v327_v9 = vmul.f32 %v325_v7, %v316_v8 }
  0xd6   : > { %v318_v11 = vpop.f32.mrf.mxu0 }
  0xd7   : > { %v335_v12 = vadd.f32 %v333_v10, %v327_v9  ;;  %v328_v13 = vmul.f32 %v325_v7, %v318_v11 }
  0xd9   : > { %v336_v14 = vadd.f32 %v333_v10, %v328_v13  ;;  %v337_v15 = vmax.f32 %v335_v12, 0.0 }
  0xdb   : > { %v338_v16 = vmax.f32 %v336_v14, 0.0 }
  0xdd   : > { %v341_v17 = vcombine.low %v337_v15, %v338_v16 }
  0xdf   : > { %343 = vst [vmem:[%s235_s5] sm:$0xff] %v341_v17 }
  0xe0 PF: > { %s14_s17 = sadd.s32 1, %s497_s17   ;;  %s573_s15 = smov %s493_s16 }
  0xe1   : > { %p11_p5 = scmp.ge.s32.totalorder %s14_s17, 4   ;;  %s574_s16 = smov %s576_s18 }
  0xe3   :  { %13 = sbr.rel (!%p11_p5) target bundleno = 2 (0x2), region = 66 }

// kernel: attention_module_forward.2
= control target key start
LH: loop header
LB: loop body
LE: loop exit
PB: predicated region body
PF: predicated region fallthrough
CT: control target
= control target key end

     0   :  { %s502_s12 = smov 0   ;;  %s504_s13 = smov 0   ;;  %s551_s0 = inlined_call_operand.vmem [shape: f32[2,4,256], index: 0, kind: input, shape index: {}]   ;;  %s552_s1 = inlined_call_operand.vmem [shape: f32[4,4], index: 1, kind: input, shape index: {}]   ;;  %s553_s2 = inlined_call_operand.vmem [shape: f32[2,4,1], index: 2, kind: output, shape index: {0}]   ;;  %s554_s3 = inlined_call_operand.vmem [shape: f32[2,4,1], index: 3, kind: output, shape index: {1}]  }
   0x1   :  { %s506_s14 = smov 0  }
   0x2 LB: > { %s26_s15 = sadd.s32 1, %s475_s13  ;;  %p420_p0 = scmp.ge.s32.totalorder %s479_s14, 1  ;;  %s479_s14 = sphi %s506_s14, %s14_s14   ;;  %s475_s13 = sphi %s504_s13, %s556_s13   ;;  %s471_s12 = sphi %s502_s12, %s555_s12  }
   0x3   : > { %p28_p1 = scmp.ge.s32.totalorder %s26_s15, 2  ;;  %p159_p2 = scmp.lt.s32.totalorder %s479_s14, 3 }
   0x5   : > { %s558_s15 = smov (%p28_p1, %s26_s15), 0  ;;  %p160_p3 = pnand %p420_p0, %p159_p2 }
   0x6   : > { %p191_p4 = scmp.lt.s32.totalorder (!%p160_p3), %s471_s12, 1 }
   0x7   : > { %163 = sbr.rel (%p160_p3) target bundleno = 363 (0x16b), region = 28 }
   0xc   : > { %v481_v0 = vmov 0.0   ;;  %s560_s12 = smov (!%p191_p4, %s471_s12), 1  ;;  %vm223_vm0 = vcmask 1043456   ;;  %v215_v3 = vld [vmem:[%s552_s1] sm:$0xf]  ;;  %vm219_vm1 = vcmask 31744  }
   0xd   : > { %292 = vmatprep.mubr.f32.mxu0 %v481_v0  ;;  %s430_s16 = sshll.u32 %s560_s12, 3  ;;  %s423_s22 = sshll.u32 %s560_s12, 2  ;;  %vm212_vm2 = vcmask 3072  }
   0xe   : > { %s198_s19 = scalar_lea.vmem %s551_s0, %s430_s16  ;;  %s203_s25 = scalar_lea.vmem %s553_s2, %s423_s22 }
   0xf   : > { %v216_v1 = vld [vmem:[%s198_s19] sm:$0xff]  ;;  %213 = vst.msk [vmem:[%s203_s25] sm:$0xf] %vm212_vm2, %v481_v0  ;;  %s207_s28 = scalar_lea.vmem %s554_s3, %s423_s22 }
  0x10   : > { %v218_v2 = vcombine.high %v216_v1, %v216_v1  ;;  %214 = vst.msk [vmem:[%s207_s28] sm:$0xf] %vm212_vm2, %v481_v0 }
  0x12   : > { %425 = vmatprep.subr.msk.mxu0 %vm223_vm0, %v218_v2 }
  0x13   : > { %426 = vmatpush1.msk.msra.mxu0 %vm223_vm0, %v216_v1 }
  0x14   : > { %427 = vmatmul.mubr.msk.f32.vlgmr.msra.gmra.mxu0 %vm219_vm1, %v215_v3 }
  0x16   : > { %v299_v14 = vld [vmem:[%s203_s25] sm:$0xf] }
  0x17   : > { %v308_v17 = vld [vmem:[%s207_s28] sm:$0xf] }
  0xd4   : > { %v294_v4 = vpop.f32.mrf.mxu0 }
  0xd5   : > { %v309_v6 = vmul.f32 %v294_v4, %v294_v4  ;;  %v300_v9 = vsel %vm223_vm0, %v294_v4, 0.0 }
  0xd6   : > { %v296_v5 = vpop.f32.mrf.mxu0 }
  0xd7   : > { %v301_v7 = vsel %vm223_vm0, %v296_v5, 0.0  ;;  %v310_v8 = vmul.f32 %v296_v5, %v296_v5  ;;  %v311_v12 = vsel %vm223_vm0, %v309_v6, 0.0 }
  0xd8   : > { %v302_v10 = vadd.f32 %v301_v7, %v300_v9 }
  0xd9   : > { %v312_v11 = vsel %vm223_vm0, %v310_v8, 0.0 }
  0xda   : > { %303 = vadd.xlane.f32.xlu0 %v302_v10  ;;  %v313_v13 = vadd.f32 %v312_v11, %v311_v12 }
  0xde   : > { %314 = vadd.xlane.f32.xlu0 %v313_v13 }
 0x163   : > { %v304_v15 = vpop.xlane.xlu0 %303 }
 0x164   : > { %v305_v16 = vadd.f32 %v304_v15, %v299_v14 }
 0x166   : > { %307 = vst.msk [vmem:[%s203_s25] sm:$0xf] %vm212_vm2, %v305_v16 }
 0x167   : > { %v315_v18 = vpop.xlane.xlu0 %314 }
 0x168   : > { %v316_v19 = vadd.f32 %v315_v18, %v308_v17 }
 0x16a   : > { %317 = vst.msk [vmem:[%s207_s28] sm:$0xf] %vm212_vm2, %v316_v19 }
 0x16b PF: > { %s14_s14 = sadd.s32 1, %s479_s14   ;;  %s555_s12 = smov %s475_s13 }
 0x16c   : > { %p11_p5 = scmp.ge.s32.totalorder %s14_s14, 4   ;;  %s556_s13 = smov %s558_s15 }
 0x16e   :  { %13 = sbr.rel (!%p11_p5) target bundleno = 2 (0x2), region = 74 }

</bundles_post_ra>
